<compile_context>
chip_gen: v5e
topology: v5e:2x2
jax: 0.10.0
libtpu: 0.0.40
codegen_flags: <defaults>
</compile_context>

<pallas_src>
import functools

import jax
import jax.numpy as jnp
from jax.experimental import pallas as pl
from jax.experimental.pallas import tpu as pltpu

_EPS = 1e-12


def _round_up(x, n):
    return ((x + n - 1) // n) * n


def _col_inv_norm_kernel(w_ref, inv_ref):
    """(1, TILE_C) inverse L2 norms of w's columns — hoisted out of the B loop."""
    w = w_ref[...].astype(jnp.float32)
    inv_ref[...] = jax.lax.rsqrt(jnp.sum(w * w, axis=0, keepdims=True) + _EPS)


def _cm_loss_kernel(x_ref, w_ref, invw_ref, lab_ref,      # inputs
                    loss_ref, correct_ref,                 # outputs (per-row)
                    ix_sc, m_sc, l_sc, tgt_sc, arg_sc,     # VMEM scratch
                    *, m, s, tile_c, num_classes, padded_c):
    c = pl.program_id(1)
    n_c = pl.num_programs(1)

    @pl.when(c == 0)
    def _init():
        x = x_ref[...].astype(jnp.float32)
        ix_sc[...] = jax.lax.rsqrt(jnp.sum(x * x, axis=1, keepdims=True) + _EPS)
        m_sc[...] = jnp.full_like(m_sc, -jnp.inf)
        l_sc[...] = jnp.zeros_like(l_sc)
        tgt_sc[...] = jnp.zeros_like(tgt_sc)
        arg_sc[...] = jnp.zeros_like(arg_sc)

    # Cosine logits for this (B tile, C tile): MXU matmul in the input dtype,
    # f32 accumulation, then fold in the row/column inverse norms on the VPU.
    logits = jnp.dot(x_ref[...], w_ref[...], preferred_element_type=jnp.float32)
    cos = logits * ix_sc[...] * invw_ref[...].astype(jnp.float32)

    tb, tc = cos.shape
    labels = lab_ref[...]                                            # (TB, 1) i32
    col = jax.lax.broadcasted_iota(jnp.int32, (tb, tc), 1) + c * tile_c
    is_label = col == labels
    # value = s * (cos - m * one_hot)   (no dense one-hot materialized)
    value = s * jnp.where(is_label, cos - m, cos)
    if padded_c != num_classes:  # mask class-padding columns (static branch)
        value = jnp.where(col < num_classes, value, -jnp.inf)

    tile_max = jnp.max(value, axis=1, keepdims=True)                 # (TB, 1)
    tile_arg = jnp.min(jnp.where(value == tile_max, col, padded_c),
                       axis=1, keepdims=True)                        # first idx

    # Online LSE / argmax / target-logit update.
    m_old = m_sc[...]
    m_new = jnp.maximum(m_old, tile_max)
    l_sc[...] = l_sc[...] * jnp.exp(m_old - m_new) + jnp.sum(
        jnp.exp(value - m_new), axis=1, keepdims=True)
    m_sc[...] = m_new
    tgt_sc[...] += jnp.sum(jnp.where(is_label, value, 0.0), axis=1, keepdims=True)
    # strict ">" keeps the earliest tile on ties -> torch argmax/topk tie-breaking
    arg_sc[...] = jnp.where(tile_max > m_old, tile_arg, arg_sc[...])

    @pl.when(c == n_c - 1)
    def _finalize():
        lse = m_sc[...] + jnp.log(l_sc[...])
        loss_ref[...] = lse - tgt_sc[...]                            # per-row CE
        correct_ref[...] = (arg_sc[...] == labels).astype(jnp.float32)


def cosine_margin_loss(x, w, labels, m=0.35, s=64.0, tile_b=128, tile_c=256):
    """Returns (loss, prec1) matching CosineMarginLoss.forward."""
    B, D = x.shape
    Dw, C = w.shape
    assert D == Dw

    # Tile sizes: TILE_B multiple of 8 sublanes (collapses to one padded tile for
    # small B); TILE_C a multiple of 128 lanes.  Raise tile_c to 512-2048 for
    # production class counts (VMEM permitting: 64 MiB/TC on v7x).
    tile_b = min(tile_b, _round_up(B, 8))
    tile_c = min(tile_c, _round_up(C, 128))
    b_pad = _round_up(B, tile_b)
    c_pad = _round_up(C, tile_c)

    x_p = jnp.pad(x, ((0, b_pad - B), (0, 0))) if b_pad != B else x
    w_p = jnp.pad(w, ((0, 0), (0, c_pad - C))) if c_pad != C else w
    lab_p = jnp.pad(labels.astype(jnp.int32), (0, b_pad - B)).reshape(b_pad, 1)

    # Pass 1: (1, C) inverse column norms of w (computed once, not per B tile).
    inv_w = pl.pallas_call(
        _col_inv_norm_kernel,
        out_shape=jax.ShapeDtypeStruct((1, c_pad), jnp.float32),
        grid=(c_pad // tile_c,),
        in_specs=[pl.BlockSpec((D, tile_c), lambda c: (0, c))],
        out_specs=pl.BlockSpec((1, tile_c), lambda c: (0, c)),
        compiler_params=pltpu.CompilerParams(
            dimension_semantics=("parallel",)),
    )(w_p)

    # Pass 2: tiled cosine-margin cross entropy + top-1.
    grid = (b_pad // tile_b, c_pad // tile_c)
    loss_rows, correct_rows = pl.pallas_call(
        functools.partial(_cm_loss_kernel, m=float(m), s=float(s),
                          tile_c=tile_c, num_classes=C, padded_c=c_pad),
        out_shape=(
            jax.ShapeDtypeStruct((b_pad, 1), jnp.float32),
            jax.ShapeDtypeStruct((b_pad, 1), jnp.float32),
        ),
        grid=grid,
        in_specs=[
            pl.BlockSpec((tile_b, D), lambda b, c: (b, 0)),       # x
            # TODO(synk): if the w-tile DMA shows up exposed for small D, add
            # pipeline_mode=pl.Buffered(3) here.
            pl.BlockSpec((D, tile_c), lambda b, c: (0, c)),       # w
            pl.BlockSpec((1, tile_c), lambda b, c: (0, c)),       # inv col norms
            pl.BlockSpec((tile_b, 1), lambda b, c: (b, 0)),       # labels
        ],
        out_specs=(
            pl.BlockSpec((tile_b, 1), lambda b, c: (b, 0)),       # per-row loss
            pl.BlockSpec((tile_b, 1), lambda b, c: (b, 0)),       # per-row correct
        ),
        scratch_shapes=[
            pltpu.VMEM((tile_b, 1), jnp.float32),   # 1/||x|| rows
            pltpu.VMEM((tile_b, 1), jnp.float32),   # running max
            pltpu.VMEM((tile_b, 1), jnp.float32),   # running sum-exp
            pltpu.VMEM((tile_b, 1), jnp.float32),   # target logit
            pltpu.VMEM((tile_b, 1), jnp.int32),     # running argmax
        ],
        compiler_params=pltpu.CompilerParams(
            dimension_semantics=("parallel", "arbitrary")),
    )(x_p, w_p, inv_w, lab_p)

    # Tiny O(B) reductions (mean over true batch rows only; padding sliced off).
    loss = jnp.mean(loss_rows[:B, 0])
    prec1 = 100.0 * jnp.mean(correct_rows[:B, 0])
    return loss, prec1


def reference(x, w, labels, m=0.35, s=64.0):
    x_norm = x / jnp.linalg.norm(x, axis=1, keepdims=True)
    w_norm = w / jnp.linalg.norm(w, axis=0, keepdims=True)
    xw = jnp.matmul(x_norm, w_norm, precision=jax.lax.Precision.HIGHEST)
    onehot = jax.nn.one_hot(labels, w.shape[1], dtype=jnp.float32) * m
    value = s * (xw - onehot)
    logp = jax.nn.log_softmax(value, axis=1)
    loss = -jnp.mean(jnp.take_along_axis(logp, labels[:, None], axis=1))
    prec1 = 100.0 * jnp.mean((jnp.argmax(value, axis=1) == labels).astype(jnp.float32))
    return loss, prec1


if __name__ == "__main__":
    # Small shapes consistent with the module: batch=8, embed_dim=32, classes=500
    # (500 deliberately not a multiple of 128/256 to exercise class padding/masking).
    B, D, C = 8, 32, 500
    key = jax.random.PRNGKey(0)
    kx, kw, kl = jax.random.split(key, 3)

    x = jax.random.normal(kx, (B, D), dtype=jnp.float32)
    w = jax.random.normal(kw, (D, C), dtype=jnp.float32)   # nn.Parameter(randn(D, C))
    labels = jax.random.randint(kl, (B,), 0, C, dtype=jnp.int32)

    loss, prec1 = cosine_margin_loss(x, w, labels, m=0.35, s=64.0)
    jax.block_until_ready((loss, prec1))

    ref_loss, ref_prec1 = reference(x, w, labels, m=0.35, s=64.0)
    assert jnp.allclose(loss, ref_loss, rtol=5e-3, atol=5e-3), (loss, ref_loss)
    assert jnp.allclose(prec1, ref_prec1, rtol=1e-4, atol=1e-3), (prec1, ref_prec1)

    print("KERNEL_OK")
</pallas_src>

<mosaic_0001>
module attributes {stable_mosaic.version = 11 : i64} {
  func.func @_col_inv_norm_kernel(%arg0: i32, %arg1: memref<32x256xf32, #tpu.memory_space<vmem>>, %arg2: memref<1x256xf32, #tpu.memory_space<vmem>>) attributes {dimension_semantics = [#tpu.dimension_semantics<parallel>], iteration_bounds = array<i64: 2>, scalar_prefetch = 0 : i64, scratch_operands = 0 : i64, tpu.core_type = #tpu.core_type<tc>, window_params = [{transform_indices = @transform_0, window_bounds = array<i64: 32, 256>}, {transform_indices = @transform_1, window_bounds = array<i64: 1, 256>}]} {
    %c0 = arith.constant 0 : index
    %c0_0 = arith.constant 0 : index
    %0 = vector.load %arg1[%c0, %c0_0] : memref<32x256xf32, #tpu.memory_space<vmem>>, vector<32x256xf32>
    %1 = arith.mulf %0, %0 : vector<32x256xf32>
    %cst = arith.constant dense<0.000000e+00> : vector<256xf32>
    %2 = vector.multi_reduction <add>, %1, %cst [0] : vector<32x256xf32> to vector<256xf32>
    %3 = vector.shape_cast %2 : vector<256xf32> to vector<1x256xf32>
    %cst_1 = arith.constant 9.99999996E-13 : f32
    %4 = vector.broadcast %cst_1 : f32 to vector<1x256xf32>
    %5 = arith.addf %3, %4 : vector<1x256xf32>
    %6 = math.rsqrt %5 : vector<1x256xf32>
    %c0_2 = arith.constant 0 : index
    %c0_3 = arith.constant 0 : index
    %7 = vector.load %arg2[%c0_2, %c0_3] : memref<1x256xf32, #tpu.memory_space<vmem>>, vector<1x256xf32>
    tpu.vector_store %arg2[%c0_2, %c0_3], %6 {strides = array<i32>} : memref<1x256xf32, #tpu.memory_space<vmem>>, vector<1x256xf32>,
    return
  }
  func.func @transform_0(%arg0: i32) -> (i32, i32) {
    %c0_i32 = arith.constant 0 : i32
    %c0_i32_0 = arith.constant 0 : i32
    return %c0_i32, %arg0 : i32, i32
  }
  func.func @transform_1(%arg0: i32) -> (i32, i32) {
    %c0_i32 = arith.constant 0 : i32
    %c0_i32_0 = arith.constant 0 : i32
    return %c0_i32, %arg0 : i32, i32
  }
}

</mosaic_0001>

<bundles_post_ra>
// kernel: tpu_custom_call.1
= control target key start
LH: loop header
LB: loop body
LE: loop exit
PB: predicated region body
PF: predicated region fallthrough
CT: control target
= control target key end

     0   :  { %6 = vsyncpa [#allocation3], 0  ;;  %s602_s0 = inlined_call_operand.hbm [shape: f32[32,512], index: 0, kind: input, shape index: {}]   ;;  %s603_s1 = inlined_call_operand.hbm [shape: f32[1,512], index: 1, kind: output, shape index: {}]  }
   0x1   :  { %8 = vsyncpa [#allocation3 + $0x1], 0 }
   0x2   :  { %9 = vsyncpa [#allocation4], 0 }
   0x3   :  { %11 = vsyncpa [#allocation4 + $0x1], 0  ;;  %s470_s6 = smov 0   ;;  %s472_s7 = smov 0  }
   0x4   :  { %s474_s8 = smov 0   ;;  %s476_s9 = smov 0  }
   0x5 LB: > { %s491_s10 = sadd.s32 4294967295, %s455_s9   ;;  %s292_s11 = sadd.s32 4294967294, %s455_s9   ;;  %s455_s9 = sphi %s476_s9, %s614_s9   ;;  %s451_s8 = sphi %s474_s8, %s613_s8   ;;  %s447_s7 = sphi %s472_s7, %s612_s7   ;;  %s443_s6 = sphi %s470_s6, %s611_s6  }
   0x6   : > { %s495_s12 = sadd.s32 1, %s455_s9   ;;  %s24_s13 = sadd.s32 1, %s451_s8 }
   0x7   : > { %s21_s14 = ssub.s32 %s455_s9, %s495_s12  ;;  %p31_p0 = scmp.ne.s32.totalorder %s451_s8, %s447_s7 }
   0x8   : > { %p22_p1 = scmp.eq.s32.totalorder %s21_s14, 0  ;;  %p32_p2 = scmp.eq.s32.totalorder %s455_s9, 0 }
   0x9   : > { %p37_p3 = scmp.ne.s32.totalorder %s447_s7, %s443_s6  ;;  %p38_p4 = scmp.eq.s32.totalorder %s491_s10, 0 }
   0xa   : > { %s507_s15 = scalar_select %p22_p1, %s451_s8, %s24_s13  }
   0xb   : > { %p509_p5 = por %p32_p2, %p31_p0  ;;  %p513_p6 = por %p38_p4, %p37_p3 }
   0xc   : > { %p61_p7 = scmp.eq.s32.totalorder %s491_s10, 1  ;;  %p67_p8 = scmp.eq.s32.totalorder %s292_s11, 1 }
   0xd   : > { %p294_p9 = scmp.ge.s32.totalorder %s455_s9, 2  ;;  %p318_p10 = scmp.lt.s32.totalorder %s455_s9, 2 }
   0xe   : > { %p520_p11 = por %p61_p7, %p31_p0  ;;  %p524_p12 = por %p67_p8, %p37_p3 }
   0xf   : > { %s87_s20 = sand.u32 1, %s451_s8   ;;  %s305_s21 = sshll.u32 %s455_s9, 4 }
  0x10   : > { %s295_s22 = sshll.u32 %s87_s20, 6  ;;  %s96_s25 = scalar_lea.hbm %s602_s0, %s305_s21 }
  0x11   : > { %s97_s26 = sshll.u32 %s96_s25, 4  ;;  %s91_s27 = scalar_lea.vmem [#allocation2], %s295_s22  ;;  %s98_s26 = int_to_ptr.hbm [resolvable:$true] %s97_s26 }
  0x12   : > { %s99_s28 = sshll.u32 %s91_s27, 4  ;;  %p535_p13 = pnand %p318_p10, %p509_p5  ;;  %s100_s28 = int_to_ptr.vmem [resolvable:$true] %s99_s28 }
  0x13   : > { %p298_p0 = scmp.ge.s32.totalorder %s455_s9, 1  ;;  %s88_s30 = scalar_lea.sflag [#allocation3], %s87_s20 }
  0x14   : > { %s359_s2 = sshra.s32 %s98_s26, 4  ;;  %p363_p2 = pneg %p535_p13  ;;  %s360_s2 = int_to_ptr.hbm [resolvable:$true] %s359_s2 }
  0x15   : > { %s361_s3 = scalar_lea.hbm %s360_s2, 64  ;;  %s366_s11 = scalar_lea.hbm %s602_s0, 128 }
  0x16   : > { %p362_p1 = scmp.ne.s32.totalorder %s360_s2, %s361_s3  ;;  %p367_p5 = scmp.lt.s32.totalorder %s360_s2, %s602_s0 }
  0x17   : > { %p368_p7 = scmp.lt.s32.totalorder %s366_s11, %s361_s3 }
  0x18   : > { %p364_p3 = pnand %p363_p2, %p362_p1 }
  0x19   : > { %p369_p8 = por %p368_p7, %p367_p5 }
  0x1a   : > { %p365_p4 = pneg %p364_p3 }
  0x1c   : > { %p370_p10 = pnand %p369_p8, %p365_p4 }
  0x1e   : > { %373 = shalt.err (!%p370_p10)
}
  0x1f   : > { %s457_s16 = smov 512   ;;  %s458_s20 = smov 256  }
  0x20   : > { %s459_s21 = smov 16   ;;  %p107_p1 = scmp.lt.s32.totalorder %s455_s9, 3 }
  0x21   : > { %313 = dma.hbm_to_vmem [thread:$0]  (!%p535_p13), %s98_s26, 1024, %s100_s28, %s88_s30, %s457_s16, %s458_s20, %s459_s21  }
  0x22   : > { %p108_p2 = pnand %p298_p0, %p107_p1 }
  0x23   : > { %s554_s22 = sand.u32 (!%p108_p2), 1, %s447_s7  }
  0x24   : > { %111 = sbr.rel (%p108_p2) target bundleno = 91 (0x5b), region = 24  ;;  %s299_s23 = sshll.u32 (!%p108_p2), %s554_s22, 6 }
  0x25   : > { %s114_s24 = scalar_lea.sflag (!%p108_p2), [#allocation3], %s554_s22  ;;  %s117_s25 = scalar_lea.vmem (!%p108_p2), [#allocation2], %s299_s23 }
  0x29   : > { %434 = dma.done.wait (%p513_p6), %s114_s24, 1024  }
  0x2a   : > { %436 = vsyncadd (%p513_p6), %s114_s24, 4294966272  ;;  %v139_v0 = vld [vmem:[%s117_s25] sm:$0xff]  ;;  %v140_v1 = vld [vmem:[%s117_s25 + $0x8] sm:$0xff]  ;;  %s300_s17 = sshll.u32 %s554_s22, 1  ;;  %s302_s26 = sshll.u32 %s491_s10, 1  ;;  %v201_v48 = vlaneseq  ;;  %vm198_vm6 = vcmask 1040384  }
  0x2b   : > { %v141_v2 = vld [vmem:[%s117_s25 + $0x10] sm:$0xff]  ;;  %v142_v3 = vld [vmem:[%s117_s25 + $0x18] sm:$0xff]  ;;  %v143_v4 = vld [vmem:[%s117_s25 + $0x20] sm:$0xff]  ;;  %v147_v6 = vmul.f32 %v139_v0, %v139_v0  ;;  %v148_v7 = vmul.f32 %v140_v1, %v140_v1  ;;  %s217_s29 = scalar_lea.hbm %s603_s1, %s302_s26  ;;  %s136_s30 = scalar_lea.vmem [#allocation5], %s300_s17 }
  0x2c   : > { %v144_v5 = vld [vmem:[%s117_s25 + $0x28] sm:$0xff]  ;;  %v149_v8 = vmul.f32 %v141_v2, %v141_v2  ;;  %v145_v9 = vld [vmem:[%s117_s25 + $0x30] sm:$0xff]  ;;  %v146_v10 = vld [vmem:[%s117_s25 + $0x38] sm:$0xff]  ;;  %v150_v11 = vmul.f32 %v142_v3, %v142_v3  ;;  %v151_v12 = vmul.f32 %v143_v4, %v143_v4  ;;  %s219_s10 = sshll.u32 %s136_s30, 4  ;;  %s221_s2 = sshll.u32 %s217_s29, 4  ;;  %vm203_vm7 = vcmp.lt.s32.totalorder %v201_v48, 256  ;;  %s220_s10 = int_to_ptr.vmem [resolvable:$true] %s219_s10  ;;  %s222_s2 = int_to_ptr.hbm [resolvable:$true] %s221_s2 }
  0x2d   : > { %v152_v13 = vmul.f32 %v144_v5, %v144_v5  ;;  %v153_v14 = vmul.f32 %v145_v9, %v145_v9  ;;  %v154_v16 = vmul.f32 %v146_v10, %v146_v10  ;;  %s207_s3 = scalar_lea.sflag [#allocation4], %s554_s22  ;;  %s403_s4 = sshra.s32 %s222_s2, 4  ;;  %s404_s4 = int_to_ptr.hbm [resolvable:$true] %s403_s4 }
  0x2e   : > { %v155_v15 = vadd.f32 %v149_v8, %v147_v6  ;;  %v164_v17 = vadd.f32 %v150_v11, %v148_v7  ;;  %s405_s5 = scalar_lea.hbm %s404_s4, 2  ;;  %s409_s14 = scalar_lea.hbm %s603_s1, 4 }
  0x2f   : > { %p406_p6 = scmp.ne.s32.totalorder %s404_s4, %s405_s5  ;;  %p410_p3 = scmp.lt.s32.totalorder %s404_s4, %s603_s1 }
  0x30   : > { %v156_v18 = vadd.f32 %v155_v15, %v151_v12  ;;  %v165_v19 = vadd.f32 %v164_v17, %v152_v13  ;;  %p411_p4 = scmp.lt.s32.totalorder %s409_s14, %s405_s5 }
  0x31   : > { %p407_p13 = pnand %p406_p6, %p520_p11 }
  0x32   : > { %v157_v20 = vadd.f32 %v156_v18, %v153_v14  ;;  %v166_v21 = vadd.f32 %v165_v19, %v154_v16  ;;  %p412_p5 = por %p411_p4, %p410_p3 }
  0x33   : > { %p408_p0 = pneg %p407_p13 }
  0x34   : > { %v158_v22 = vrot.slane %v157_v20, 4  ;;  %v167_v23 = vrot.slane %v166_v21, 4 }
  0x35   : > { %p413_p7 = pnand %p412_p5, %p408_p0 }
  0x36   : > { %v159_v24 = vadd.f32 %v158_v22, %v157_v20  ;;  %v168_v25 = vadd.f32 %v167_v23, %v166_v21 }
  0x38   : > { %v160_v26 = vrot.slane %v159_v24, 2  ;;  %v169_v27 = vrot.slane %v168_v25, 2 }
  0x3a   : > { %v161_v28 = vadd.f32 %v160_v26, %v159_v24  ;;  %v170_v29 = vadd.f32 %v169_v27, %v168_v25 }
  0x3c   : > { %v162_v30 = vrot.slane %v161_v28, 1  ;;  %v171_v31 = vrot.slane %v170_v29, 1 }
  0x3e   : > { %v163_v32 = vadd.f32 %v162_v30, %v161_v28  ;;  %v172_v33 = vadd.f32 %v171_v31, %v170_v29 }
  0x40   : > { %v173_v34 = vadd.f32 1e-12, %v163_v32  ;;  %v174_v35 = vadd.f32 1e-12, %v172_v33 }
  0x42   : > { %355 = vrsqrt.f32 %v173_v34  ;;  %vm181_vm0 = vweird.f32 %v173_v34  ;;  %vm191_vm2 = vweird.f32 %v174_v35 }
  0x43   : > { %357 = vrsqrt.f32 %v174_v35 }
  0x48   : > { %v356_v36 = vpop.eup %355 }
  0x49   : > { %v358_v37 = vpop.eup %357  ;;  %v176_v38 = vmul.f32 %v356_v36, %v173_v34  ;;  %vm182_vm1 = vweird.f32 %v356_v36 }
  0x4a   : > { %v186_v39 = vmul.f32 %v358_v37, %v174_v35  ;;  %vm192_vm3 = vweird.f32 %v358_v37  ;;  %vm564_vm4 = vmor %vm181_vm0, %vm182_vm1 }
  0x4b   : > { %v177_v40 = vmul.f32 %v356_v36, %v176_v38  ;;  %vm193_vm5 = vmor %vm191_vm2, %vm192_vm3 }
  0x4c   : > { %v187_v41 = vmul.f32 %v358_v37, %v186_v39 }
  0x4d   : > { %v178_v42 = vmul.f32 0.5, %v177_v40 }
  0x4e   : > { %v188_v43 = vmul.f32 0.5, %v187_v41 }
  0x4f   : > { %v179_v44 = vsub.f32 1.5, %v178_v42 }
  0x50   : > { %v189_v46 = vsub.f32 1.5, %v188_v43 }
  0x51   : > { %v180_v47 = vmul.f32 %v356_v36, %v179_v44 }
  0x52   : > { %v190_v49 = vmul.f32 %v358_v37, %v189_v46 }
  0x53   : > { %v184_v50 = vsel %vm564_vm4, %v356_v36, %v180_v47 }
  0x54   : > { %v194_v51 = vsel %vm193_vm5, %v358_v37, %v190_v49 }
  0x55   : > { %v197_v52 = vrot.slane %v194_v51, 7 }
  0x57   : > { %v199_v53 = vsel %vm198_vm6, %v184_v50, %v197_v52 }
  0x58   : > { %205 = vst.msk [vmem:[%s136_s30] sm:$0x3] %vm203_vm7, %v199_v53 }
  0x59   : > { %416 = shalt.err (!%p413_p7)
}
  0x5a   : > { %308 = dma.vmem_to_hbm [thread:$0]  (%p520_p11), %s220_s10, 32, %s222_s2, %s207_s3  }
  0x5b PF: > { %s233_s21 = sand.u32 1, %s443_s6   ;;  %p315_p8 = pnand %p294_p9, %p524_p12 }
  0x5c   : > { %s234_s22 = scalar_lea.sflag [#allocation4], %s233_s21 }
  0x5d   : > { %p316_p10 = pneg %p315_p8 }
  0x5f   : > { %438 = dma.done.wait (%p316_p10), %s234_s22, 32  }
  0x60   : > { %440 = vsyncadd (%p316_p10), %s234_s22, 4294967264  ;;  %p14_p1 = scmp.ge.s32.totalorder %s495_s12, 4   ;;  %s611_s6 = smov %s447_s7 }
  0x61   : > { %s612_s7 = smov %s451_s8  ;;  %s613_s8 = smov %s507_s15 }
  0x62   : > { %s614_s9 = smov %s495_s12  ;;  %16 = sbr.rel (!%p14_p1) target bundleno = 5 (0x5), region = 69 }
  0x67   :  { %240 = vsyncpa [#allocation3], 1 }
  0x68   :  { %242 = vsyncpa [#allocation3 + $0x1], 1 }
  0x69   :  { %243 = vsyncpa [#allocation4], 1 }
  0x6a   :  { %245 = vsyncpa [#allocation4 + $0x1], 1 }

</bundles_post_ra>
